<compile_context>
chip_gen: v7x
topology: tpu7x:2x2x1
jax: 0.10.0
libtpu: 0.0.40
codegen_flags: <defaults>
</compile_context>

<pallas_src>
import jax
import jax.numpy as jnp
from jax.experimental import pallas as pl
from jax.experimental.pallas import tpu as pltpu


def _cdiv(a, b):
    return -(-a // b)


def _round_up(x, m):
    return _cdiv(x, m) * m


def _vmem_cap_bytes():
    """Generation-aware usable-VMEM budget (leave headroom for internal scratch)."""
    try:
        phys = int(getattr(pltpu.get_tpu_info(), "vmem_capacity_bytes", 64 << 20))
    except Exception:
        phys = 64 << 20                        # conservative: assume v7x (64 MiB)
    if phys <= (64 << 20):
        return 56 << 20                        # v7x
    return min(phys - (28 << 20), 100 << 20)   # v5e / v6e (128 MiB physical)


def _spec(shape, index_map, buffers=None):
    """BlockSpec; buffers=1 keeps a constant-index operand single-buffered
    (resident, no double-buffer VMEM cost).  Falls back to the default
    pipelining if the installed JAX does not expose pipeline_mode."""
    if buffers is not None:
        try:
            return pl.BlockSpec(shape, index_map, pipeline_mode=pl.Buffered(buffers))
        except (TypeError, AttributeError):
            pass
    return pl.BlockSpec(shape, index_map)


def _pick_tk(Dp, k_block):
    """Contraction tile (multiple of 128 that divides Dp)."""
    if k_block is not None:
        tk = max(128, (min(k_block, Dp) // 128) * 128)
        if Dp % tk == 0:
            return tk
    if Dp <= 2048:
        return Dp
    return max(t for t in (2048, 1024, 512, 256, 128) if Dp % t == 0)


def _mlp_kernel(x_ref, w1_ref, b1_ref, w2_ref, b2_ref, o_ref, acc_ref):
    # grid = (batch_tiles, k_tiles); K axis is last / "arbitrary".
    k = pl.program_id(1)

    @pl.when(k == 0)
    def _init():
        acc_ref[...] = jnp.zeros_like(acc_ref)

    # Cast x to the MXU compute dtype in-kernel (no wrapper pad/cast pass when
    # x is already lane-aligned); accumulate fc1 in f32.
    x = x_ref[...].astype(w1_ref.dtype)                           # (TB, TK)
    acc_ref[...] += jnp.dot(x, w1_ref[...],
                            preferred_element_type=jnp.float32)   # (TB, Hp) f32

    @pl.when(k == pl.num_programs(1) - 1)
    def _finish():
        # TODO(synk): for very large H or TB, chunk the hidden dim here instead
        # of materializing the full (TB, Hp) f32 intermediate.
        h = jnp.maximum(acc_ref[...] + b1_ref[...], 0.0)          # bias + ReLU, f32
        h = h.astype(w2_ref.dtype)                                # MXU compute dtype
        y = jnp.dot(h, w2_ref[...],
                    preferred_element_type=jnp.float32)           # (TB, Cp) f32
        o_ref[...] = (y + b2_ref[...]).astype(o_ref.dtype)


def prepare_params(w1, b1, w2, b2, *, compute_dtype=jnp.bfloat16):
    """Pad (lane-dense 128 multiples) and cast the weights ONCE.

    w1: (D, H), b1: (H,), w2: (H, C), b2: (C,) -- (in, out) layout."""
    D, H = w1.shape
    C = w2.shape[1]
    Dp, Hp, Cp = _round_up(D, 128), _round_up(H, 128), _round_up(C, 128)
    w1p = jnp.zeros((Dp, Hp), compute_dtype).at[:D, :H].set(w1.astype(compute_dtype))
    b1p = jnp.zeros((1, Hp), jnp.float32).at[0, :H].set(b1.astype(jnp.float32))
    w2p = jnp.zeros((Hp, Cp), compute_dtype).at[:H, :C].set(w2.astype(compute_dtype))
    b2p = jnp.zeros((1, Cp), jnp.float32).at[0, :C].set(b2.astype(jnp.float32))
    return dict(w1=w1p, b1=b1p, w2=w2p, b2=b2p,
                D=D, H=H, C=C, compute_dtype=compute_dtype)


def classification_model_forward(x, params, *, block_b=1024, k_block=None,
                                 out_dtype=None):
    """x: (B, D) float; params from prepare_params(). Returns (B, C)."""
    w1p, b1p, w2p, b2p = params["w1"], params["b1"], params["w2"], params["b2"]
    D, H, C = params["D"], params["H"], params["C"]
    compute_dtype = params["compute_dtype"]

    B, Dx = x.shape
    assert Dx == D, f"input_dim mismatch: {Dx} vs {D}"
    Dp, Hp = w1p.shape
    Cp = w2p.shape[1]

    cbytes = jnp.dtype(compute_dtype).itemsize
    out_dtype = out_dtype or x.dtype          # v5e tip: pass out_dtype=bf16 to halve stores
    obytes = jnp.dtype(out_dtype).itemsize
    row_mult = 16 if cbytes == 2 else 8       # bf16 packs 2 rows / sublane

    # ---- contraction (K) tiling -------------------------------------------
    TK = _pick_tk(Dp, k_block)
    n_k = Dp // TK

    # ---- batch tiling: minimal padding, even grid when B is large ----------
    n_b = max(1, _cdiv(B, block_b))
    if B >= 4 * row_mult and n_b % 2 == 1:
        n_b += 1                              # even grid -> both v7x TCs busy
    TB = _round_up(_cdiv(B, n_b), row_mult)

    # ---- VMEM budget (generation aware) and TB auto-shrink ------------------
    cap = _vmem_cap_bytes()

    def _estimate(tb, xbytes):
        w1_buf = 1 if n_k == 1 else 2
        return (2 * tb * TK * xbytes              # x tiles (double-buffered)
                + w1_buf * TK * Hp * cbytes       # w1
                + Hp * Cp * cbytes                # w2 (single-buffered)
                + (Hp + Cp) * 4                   # biases
                + 2 * tb * Cp * obytes            # out tiles (double-buffered)
                + tb * Hp * 4                     # f32 accumulator scratch
                + tb * Hp * cbytes                # relu'd hidden
                + tb * Cp * 4)                    # fc2 f32 result

    xbytes_worst = jnp.dtype(x.dtype).itemsize
    while TB > row_mult and _estimate(TB, xbytes_worst) > cap:
        TB = _round_up(TB // 2, row_mult)

    n_b = _cdiv(B, TB)
    Bp = n_b * TB

    # ---- x: skip the wrapper pad/cast pass when already aligned ------------
    pad_x = (D != Dp) or (Bp != B)
    if pad_x:
        xk = jnp.zeros((Bp, Dp), compute_dtype).at[:B, :D].set(x.astype(compute_dtype))
    else:
        xk = x                                  # cast to compute dtype in-kernel
    xbytes = jnp.dtype(xk.dtype).itemsize

    vmem_limit = int(min(cap, max(16 << 20, 2 * _estimate(TB, xbytes))))

    grid = (n_b, n_k)
    out_padded = pl.pallas_call(
        _mlp_kernel,
        out_shape=jax.ShapeDtypeStruct((Bp, Cp), out_dtype),
        grid=grid,
        in_specs=[
            pl.BlockSpec((TB, TK), lambda i, k: (i, k)),                   # x
            _spec((TK, Hp), lambda i, k: (k, 0),
                  buffers=1 if n_k == 1 else None),                        # w1
            _spec((1, Hp), lambda i, k: (0, 0), buffers=1),                # b1
            _spec((Hp, Cp), lambda i, k: (0, 0), buffers=1),               # w2
            _spec((1, Cp), lambda i, k: (0, 0), buffers=1),                # b2
        ],
        out_specs=pl.BlockSpec((TB, Cp), lambda i, k: (i, 0)),
        scratch_shapes=[pltpu.VMEM((TB, Hp), jnp.float32)],                # fc1 acc
        compiler_params=pltpu.CompilerParams(
            dimension_semantics=("parallel", "arbitrary"),
            vmem_limit_bytes=vmem_limit),
    )(xk, w1p, b1p, w2p, b2p)

    return out_padded[:B, :C]


def init_params(key, input_dim, num_classes, hidden=512):
    # Deterministic synthetic init mimicking nn.Linear's uniform(-1/sqrt(fan_in), .).
    k1, k2, k3, k4 = jax.random.split(key, 4)
    lim1 = 1.0 / (input_dim ** 0.5)
    lim2 = 1.0 / (hidden ** 0.5)
    # Stored as (in_features, out_features) -- PyTorch W transposed.
    w1 = jax.random.uniform(k1, (input_dim, hidden), jnp.float32, -lim1, lim1)
    b1 = jax.random.uniform(k2, (hidden,), jnp.float32, -lim1, lim1)
    w2 = jax.random.uniform(k3, (hidden, num_classes), jnp.float32, -lim2, lim2)
    b2 = jax.random.uniform(k4, (num_classes,), jnp.float32, -lim2, lim2)
    return w1, b1, w2, b2


if __name__ == "__main__":
    key = jax.random.PRNGKey(0)
    kx, kp, kx2, kx3 = jax.random.split(key, 4)

    input_dim, num_classes, hidden = 32, 16, 512
    w1, b1, w2, b2 = init_params(kp, input_dim, num_classes, hidden)

    def ref(xv):
        return jnp.maximum(xv @ w1 + b1, 0.0) @ w2 + b2

    # Weights padded / cast once, reused across forward calls.
    params_f32 = prepare_params(w1, b1, w2, b2, compute_dtype=jnp.float32)
    params_bf16 = prepare_params(w1, b1, w2, b2, compute_dtype=jnp.bfloat16)

    # 1) Small batch, f32 compute path: tight numerical check of the fused /
    #    lane-padded structure (padding must be a numerical no-op).
    x_small = jax.random.normal(kx, (8, input_dim), jnp.float32)
    out_f32 = jax.block_until_ready(
        classification_model_forward(x_small, params_f32))
    assert out_f32.shape == (8, num_classes)
    assert jnp.allclose(out_f32, ref(x_small), atol=1e-4, rtol=1e-4)

    # 2) B=300 (not a multiple of the tile): minimal batch padding
    #    (TB=160 -> pads 20 rows instead of 212), 2 batch tiles, bf16 MXU path.
    x_big = jax.random.normal(kx2, (300, input_dim), jnp.float32)
    out_bf16 = jax.block_until_ready(
        classification_model_forward(x_big, params_bf16))
    assert out_bf16.shape == (300, num_classes)
    assert jnp.allclose(out_bf16, ref(x_big), atol=5e-2, rtol=5e-2)

    # 3) Lane-aligned D=256, B=64: x is passed un-padded (cast in-kernel) and
    #    k_block=128 forces 2 K steps through the f32 accumulator scratch.
    d2 = 256
    w1b, b1b, w2b, b2b = init_params(kp, d2, num_classes, hidden)
    params2 = prepare_params(w1b, b1b, w2b, b2b, compute_dtype=jnp.bfloat16)
    x3 = jax.random.normal(kx3, (64, d2), jnp.float32)
    out3 = jax.block_until_ready(
        classification_model_forward(x3, params2, k_block=128))
    ref3 = jnp.maximum(x3 @ w1b + b1b, 0.0) @ w2b + b2b
    assert out3.shape == (64, num_classes)
    assert jnp.allclose(out3, ref3, atol=5e-2, rtol=5e-2)

    print("KERNEL_OK")
</pallas_src>

<mosaic_0001>
module attributes {stable_mosaic.version = 11 : i64} {
  func.func @_mlp_kernel(%arg0: i32, %arg1: i32, %arg2: memref<8x128xf32, #tpu.memory_space<vmem>>, %arg3: memref<128x512xf32, #tpu.memory_space<vmem>>, %arg4: memref<1x512xf32, #tpu.memory_space<vmem>>, %arg5: memref<512x128xf32, #tpu.memory_space<vmem>>, %arg6: memref<1x128xf32, #tpu.memory_space<vmem>>, %arg7: memref<8x128xf32, #tpu.memory_space<vmem>>, %arg8: memref<8x512xf32, #tpu.memory_space<vmem>>) attributes {dimension_semantics = [#tpu.dimension_semantics<parallel>, #tpu.dimension_semantics<arbitrary>], iteration_bounds = array<i64: 1, 1>, scalar_prefetch = 0 : i64, scratch_operands = 1 : i64, tpu.core_type = #tpu.core_type<tc>, window_params = [{transform_indices = @transform_0, window_bounds = array<i64: 8, 128>}, {pipeline_mode = #tpu.pipeline_mode<synchronous>, transform_indices = @transform_1, window_bounds = array<i64: 128, 512>}, {pipeline_mode = #tpu.pipeline_mode<synchronous>, transform_indices = @transform_2, window_bounds = array<i64: 1, 512>}, {pipeline_mode = #tpu.pipeline_mode<synchronous>, transform_indices = @transform_3, window_bounds = array<i64: 512, 128>}, {pipeline_mode = #tpu.pipeline_mode<synchronous>, transform_indices = @transform_4, window_bounds = array<i64: 1, 128>}, {transform_indices = @transform_5, window_bounds = array<i64: 8, 128>}]} {
    %c0_i32 = arith.constant 0 : i32
    %0 = arith.cmpi eq, %arg1, %c0_i32 : i32
    %1 = arith.extui %0 : i1 to i32
    %c0_i32_0 = arith.constant 0 : i32
    %2 = arith.cmpi ne, %1, %c0_i32_0 : i32
    scf.if %2 {
      %cst_10 = arith.constant 0.000000e+00 : f32
      %12 = vector.broadcast %cst_10 : f32 to vector<8x512xf32>
      %c0_11 = arith.constant 0 : index
      %c0_12 = arith.constant 0 : index
      %13 = vector.load %arg8[%c0_11, %c0_12] : memref<8x512xf32, #tpu.memory_space<vmem>>, vector<8x512xf32>
      tpu.vector_store %arg8[%c0_11, %c0_12], %12 {strides = array<i32>} : memref<8x512xf32, #tpu.memory_space<vmem>>, vector<8x512xf32>,
    } else {
    }
    %c0 = arith.constant 0 : index
    %c0_1 = arith.constant 0 : index
    %3 = vector.load %arg2[%c0, %c0_1] : memref<8x128xf32, #tpu.memory_space<vmem>>, vector<8x128xf32>
    %c0_2 = arith.constant 0 : index
    %c0_3 = arith.constant 0 : index
    %4 = vector.load %arg8[%c0_2, %c0_3] : memref<8x512xf32, #tpu.memory_space<vmem>>, vector<8x512xf32>
    %c0_4 = arith.constant 0 : index
    %c0_5 = arith.constant 0 : index
    %5 = vector.load %arg3[%c0_4, %c0_5] : memref<128x512xf32, #tpu.memory_space<vmem>>, vector<128x512xf32>
    %cst = arith.constant dense<0.000000e+00> : vector<8x512xf32>
    %6 = tpu.matmul %3, %5, %cst {dimension_numbers = #tpu.dot_dimension_numbers<[1], [0], [0], [1], [0, 0, 1, 1], [], []>} : vector<8x128xf32>, vector<128x512xf32>, vector<8x512xf32> -> vector<8x512xf32>
    %7 = arith.addf %4, %6 : vector<8x512xf32>
    %c0_6 = arith.constant 0 : index
    %c0_7 = arith.constant 0 : index
    %8 = vector.load %arg8[%c0_6, %c0_7] : memref<8x512xf32, #tpu.memory_space<vmem>>, vector<8x512xf32>
    tpu.vector_store %arg8[%c0_6, %c0_7], %7 {strides = array<i32>} : memref<8x512xf32, #tpu.memory_space<vmem>>, vector<8x512xf32>,
    %c0_i32_8 = arith.constant 0 : i32
    %9 = arith.cmpi eq, %arg1, %c0_i32_8 : i32
    %10 = arith.extui %9 : i1 to i32
    %c0_i32_9 = arith.constant 0 : i32
    %11 = arith.cmpi ne, %10, %c0_i32_9 : i32
    scf.if %11 {
      %c0_10 = arith.constant 0 : index
      %c0_11 = arith.constant 0 : index
      %12 = vector.load %arg8[%c0_10, %c0_11] : memref<8x512xf32, #tpu.memory_space<vmem>>, vector<8x512xf32>
      %c0_12 = arith.constant 0 : index
      %c0_13 = arith.constant 0 : index
      %13 = vector.load %arg4[%c0_12, %c0_13] : memref<1x512xf32, #tpu.memory_space<vmem>>, vector<1x512xf32>
      %14 = vector.broadcast %13 : vector<1x512xf32> to vector<8x512xf32>
      %15 = arith.addf %12, %14 : vector<8x512xf32>
      %cst_14 = arith.constant 0.000000e+00 : f32
      %16 = vector.broadcast %cst_14 : f32 to vector<8x512xf32>
      %17 = arith.maximumf %15, %16 : vector<8x512xf32>
      %c0_15 = arith.constant 0 : index
      %c0_16 = arith.constant 0 : index
      %18 = vector.load %arg5[%c0_15, %c0_16] : memref<512x128xf32, #tpu.memory_space<vmem>>, vector<512x128xf32>
      %cst_17 = arith.constant dense<0.000000e+00> : vector<8x128xf32>
      %19 = tpu.matmul %17, %18, %cst_17 {dimension_numbers = #tpu.dot_dimension_numbers<[1], [0], [0], [1], [0, 0, 1, 1], [], []>} : vector<8x512xf32>, vector<512x128xf32>, vector<8x128xf32> -> vector<8x128xf32>
      %c0_18 = arith.constant 0 : index
      %c0_19 = arith.constant 0 : index
      %20 = vector.load %arg6[%c0_18, %c0_19] : memref<1x128xf32, #tpu.memory_space<vmem>>, vector<1x128xf32>
      %21 = vector.broadcast %20 : vector<1x128xf32> to vector<8x128xf32>
      %22 = arith.addf %19, %21 : vector<8x128xf32>
      %c0_20 = arith.constant 0 : index
      %c0_21 = arith.constant 0 : index
      %23 = vector.load %arg7[%c0_20, %c0_21] : memref<8x128xf32, #tpu.memory_space<vmem>>, vector<8x128xf32>
      tpu.vector_store %arg7[%c0_20, %c0_21], %22 {strides = array<i32>} : memref<8x128xf32, #tpu.memory_space<vmem>>, vector<8x128xf32>,
    } else {
    }
    return
  }
  func.func @transform_0(%arg0: i32, %arg1: i32) -> (i32, i32) {
    %c0_i32 = arith.constant 0 : i32
    return %arg0, %arg1 : i32, i32
  }
  func.func @transform_1(%arg0: i32, %arg1: i32) -> (i32, i32) {
    %c0_i32 = arith.constant 0 : i32
    %c0_i32_0 = arith.constant 0 : i32
    return %arg1, %c0_i32 : i32, i32
  }
  func.func @transform_2(%arg0: i32, %arg1: i32) -> (i32, i32) {
    %c0_i32 = arith.constant 0 : i32
    %c0_i32_0 = arith.constant 0 : i32
    %c0_i32_1 = arith.constant 0 : i32
    return %c0_i32, %c0_i32_0 : i32, i32
  }
  func.func @transform_3(%arg0: i32, %arg1: i32) -> (i32, i32) {
    %c0_i32 = arith.constant 0 : i32
    %c0_i32_0 = arith.constant 0 : i32
    %c0_i32_1 = arith.constant 0 : i32
    return %c0_i32, %c0_i32_0 : i32, i32
  }
  func.func @transform_4(%arg0: i32, %arg1: i32) -> (i32, i32) {
    %c0_i32 = arith.constant 0 : i32
    %c0_i32_0 = arith.constant 0 : i32
    %c0_i32_1 = arith.constant 0 : i32
    return %c0_i32, %c0_i32_0 : i32, i32
  }
  func.func @transform_5(%arg0: i32, %arg1: i32) -> (i32, i32) {
    %c0_i32 = arith.constant 0 : i32
    %c0_i32_0 = arith.constant 0 : i32
    return %arg0, %c0_i32 : i32, i32
  }
}

</mosaic_0001>

<bundles_post_ra>
// kernel: tpu_custom_call.1
= control target key start
LH: loop header
LB: loop body
LE: loop exit
PB: predicated region body
PF: predicated region fallthrough
CT: control target
= control target key end

     0   :  { %10 = vsyncpa [#allocation4], 0  ;;  %s947_s0 = inlined_call_operand.hbm [shape: f32[8,128], index: 0, kind: input, shape index: {}]   ;;  %s948_s1 = inlined_call_operand.hbm [shape: f32[128,512], index: 1, kind: input, shape index: {}]   ;;  %s949_s2 = inlined_call_operand.vmem [shape: f32[1,512], index: 2, kind: input, shape index: {}]   ;;  %s950_s3 = inlined_call_operand.hbm [shape: f32[512,128], index: 3, kind: input, shape index: {}]   ;;  %s951_s4 = inlined_call_operand.vmem [shape: f32[1,128], index: 4, kind: input, shape index: {}]   ;;  %s952_s5 = inlined_call_operand.hbm [shape: f32[8,128], index: 5, kind: output, shape index: {}]  }
   0x1   :  { %11 = vsyncpa [#allocation7], 0 }
   0x2   :  { %12 = vsyncpa [#allocation5], 0  ;;  %s854_s18 = smov [#allocation6]   ;;  %s760_s22 = scalar_lea.hbm %s948_s1, 8192 }
   0x3   :  { %s28_s19 = sshll.u32 %s854_s18, 4  ;;  %p761_p0 = scmp.ne.s32.totalorder %s948_s1, %s760_s22  ;;  %s29_s19 = int_to_ptr.vmem [resolvable:$true] %s28_s19 }
   0x4   :  { %p764_p1 = scmp.lt.u32.totalorder %s760_s22, %s948_s1 }
   0x6   :  { %p766_p2 = pnand %p764_p1, %p761_p0 }
   0x8   :  { %769 = shalt.err (!%p766_p2)
}
   0x9   :  { %s770_s27 = scalar_lea.vmem %s29_s19, 8192  ;;  %p775_p4 = scmp.lt.s32.totalorder %s29_s19, %s29_s19 }
   0xa   :  { %p771_p3 = scmp.ne.s32.totalorder %s29_s19, %s770_s27  ;;  %p776_p5 = scmp.lt.s32.totalorder %s770_s27, %s770_s27 }
   0xc   :  { %p777_p6 = por %p776_p5, %p775_p4 }
   0xe   :  { %p778_p7 = pnand %p777_p6, %p771_p3 }
  0x10   :  { %781 = shalt.err (!%p778_p7)
}
  0x11   :  { %s855_s28 = smov 512   ;;  %s856_s29 = smov 32  }
  0x12   :  { %34 = dma.hbm_to_vmem [thread:$0]  %s948_s1, 8192, %s29_s19, [#allocation7], %s855_s28, %s855_s28, %s856_s29  }
  0x13   :  { %s857_s7 = smov [#allocation3]   ;;  %s858_s9 = smov [#allocation8]  }
  0x14   :  { %s19_s8 = sshll.u32 %s857_s7, 4  ;;  %s42_s10 = sshll.u32 %s858_s9, 4  ;;  %s20_s8 = int_to_ptr.vmem [resolvable:$true] %s19_s8  ;;  %s43_s10 = int_to_ptr.vmem [resolvable:$true] %s42_s10 }
  0x15   :  { %s782_s13 = scalar_lea.hbm %s947_s0, 128 }
  0x16   :  { %p783_p8 = scmp.ne.s32.totalorder %s947_s0, %s782_s13  ;;  %p786_p9 = scmp.lt.u32.totalorder %s782_s13, %s947_s0 }
  0x18   :  { %p788_p10 = pnand %p786_p9, %p783_p8 }
  0x1a   :  { %791 = shalt.err (!%p788_p10)
}
  0x1b   :  { %s792_s1 = scalar_lea.vmem %s20_s8, 128  ;;  %p797_p12 = scmp.lt.s32.totalorder %s20_s8, %s20_s8 }
  0x1c   :  { %p793_p11 = scmp.ne.s32.totalorder %s20_s8, %s792_s1  ;;  %p798_p13 = scmp.lt.s32.totalorder %s792_s1, %s792_s1 }
  0x1e   :  { %p799_p0 = por %p798_p13, %p797_p12 }
  0x20   :  { %p800_p1 = pnand %p799_p0, %p793_p11 }
  0x22   :  { %803 = shalt.err (!%p800_p1)
}
  0x23   :  { %22 = dma.hbm_to_vmem [thread:$0]  %s947_s0, 128, %s20_s8, [#allocation4]  }
  0x24   :  { %s804_s22 = scalar_lea.hbm %s950_s3, 8192 }
  0x25   :  { %p805_p2 = scmp.ne.s32.totalorder %s950_s3, %s804_s22  ;;  %p808_p3 = scmp.lt.u32.totalorder %s804_s22, %s950_s3 }
  0x27   :  { %p810_p4 = pnand %p808_p3, %p805_p2 }
  0x29   :  { %813 = shalt.err (!%p810_p4)
}
  0x2a   :  { %s814_s27 = scalar_lea.vmem %s43_s10, 8192  ;;  %p819_p6 = scmp.lt.s32.totalorder %s43_s10, %s43_s10 }
  0x2b   :  { %p815_p5 = scmp.ne.s32.totalorder %s43_s10, %s814_s27  ;;  %p820_p7 = scmp.lt.s32.totalorder %s814_s27, %s814_s27 }
  0x2d   :  { %p821_p8 = por %p820_p7, %p819_p6 }
  0x2f   :  { %p822_p9 = pnand %p821_p8, %p815_p5 }
  0x31   :  { %825 = shalt.err (!%p822_p9)
}
  0x32   :  { %s859_s0 = smov 128   ;;  %s860_s28 = smov 8  }
  0x33   :  { %48 = dma.hbm_to_vmem [thread:$0]  %s950_s3, 8192, %s43_s10, [#allocation7], %s859_s0, %s859_s0, %s860_s28  }
  0x34   :  { %848 = dma.done.wait [#allocation4], 128  }
  0x35   :  { %849 = vsyncadd [#allocation4], 4294967168 }
  0x36   :  { %850 = dma.done.wait [#allocation7], 16384  }
  0x37   :  { %851 = vsyncadd [#allocation7], 4294950912  ;;  %v861_v0 = vmov 0.0   ;;  %v74_v1 = vld [vmem:[#allocation6 + $0x8] sm:$0xff]  ;;  %v76_v3 = vld [vmem:[#allocation6 + $0x18] sm:$0xff]  ;;  %s862_s8 = smov [#allocation9]  }
  0x38   :  { %201 = vmatprep.mubr.f32.mxu0 %v861_v0  ;;  %272 = vmatprep.mubr.f32.mxu1 %v861_v0  ;;  %v78_v2 = vld [vmem:[#allocation6 + $0x28] sm:$0xff]  ;;  %v80_v5 = vld [vmem:[#allocation6 + $0x38] sm:$0xff]  ;;  %v73_v6 = vld [vmem:[#allocation6] sm:$0xff]  ;;  %s542_s9 = sshll.u32 %s862_s8, 4  ;;  %s543_s9 = int_to_ptr.vmem [resolvable:$true] %s542_s9 }
  0x39   :  { %v623_v4 = vpack.c.bf16 %v78_v2, %v74_v1  ;;  %v77_v7 = vld [vmem:[#allocation6 + $0x20] sm:$0xff]  ;;  %v655_v8 = vpack.c.bf16 %v80_v5, %v76_v3  ;;  %v75_v10 = vld [vmem:[#allocation6 + $0x10] sm:$0xff]  ;;  %v82_v12 = vld [vmem:[#allocation6 + $0x48] sm:$0xff]  ;;  %s826_s10 = scalar_lea.vmem %s543_s9, 128  ;;  %p831_p11 = scmp.lt.s32.totalorder %s543_s9, %s543_s9 }
  0x3a   :  { %v625_v9 = vpack.c.bf16 %v77_v7, %v73_v6  ;;  %v79_v11 = vld [vmem:[#allocation6 + $0x30] sm:$0xff]  ;;  %v86_v14 = vld [vmem:[#allocation6 + $0x68] sm:$0xff]  ;;  %v84_v15 = vld [vmem:[#allocation6 + $0x58] sm:$0xff]  ;;  %p827_p10 = scmp.ne.s32.totalorder %s543_s9, %s826_s10  ;;  %p832_p12 = scmp.lt.s32.totalorder %s826_s10, %s826_s10 }
  0x3b   :  { %624 = vmatprep.subr.bf16.mxu0 %v623_v4  ;;  %v657_v13 = vpack.c.bf16 %v79_v11, %v75_v10  ;;  %v88_v16 = vld [vmem:[#allocation6 + $0x78] sm:$0xff]  ;;  %656 = vmatprep.subr.bf16.mxu1 %v655_v8  ;;  %v627_v17 = vpack.c.bf16 %v86_v14, %v82_v12  ;;  %v81_v19 = vld [vmem:[#allocation6 + $0x40] sm:$0xff]  ;;  %v83_v21 = vld [vmem:[#allocation6 + $0x50] sm:$0xff] }
  0x3c   :  { %626 = vmatpush1.bf16.msra.mxu0 %v625_v9  ;;  %v659_v18 = vpack.c.bf16 %v88_v16, %v84_v15  ;;  %v85_v20 = vld [vmem:[#allocation6 + $0x60] sm:$0xff]  ;;  %v87_v23 = vld [vmem:[#allocation6 + $0x70] sm:$0xff]  ;;  %v90_v24 = vld [vmem:[#allocation6 + $0x88] sm:$0xff]  ;;  %p833_p13 = por %p832_p12, %p831_p11 }
  0x3d   :  { %658 = vmatpush1.bf16.msra.mxu1 %v657_v13  ;;  %v629_v22 = vpack.c.bf16 %v85_v20, %v81_v19  ;;  %v94_v25 = vld [vmem:[#allocation6 + $0xa8] sm:$0xff]  ;;  %628 = vmatprep.subr.bf16.mxu0 %v627_v17  ;;  %v661_v26 = vpack.c.bf16 %v87_v23, %v83_v21  ;;  %v92_v28 = vld [vmem:[#allocation6 + $0x98] sm:$0xff]  ;;  %v89_v30 = vld [vmem:[#allocation6 + $0x80] sm:$0xff] }
  0x3e   :  { %660 = vmatprep.subr.bf16.mxu1 %v659_v18  ;;  %v631_v27 = vpack.c.bf16 %v94_v25, %v90_v24  ;;  %v96_v29 = vld [vmem:[#allocation6 + $0xb8] sm:$0xff]  ;;  %v93_v32 = vld [vmem:[#allocation6 + $0xa0] sm:$0xff]  ;;  %v91_v33 = vld [vmem:[#allocation6 + $0x90] sm:$0xff]  ;;  %p834_p0 = pnand %p833_p13, %p827_p10 }
  0x3f   :  { %v663_v31 = vpack.c.bf16 %v96_v29, %v92_v28  ;;  %v95_v34 = vld [vmem:[#allocation6 + $0xb0] sm:$0xff]  ;;  %v633_v35 = vpack.c.bf16 %v93_v32, %v89_v30  ;;  %v98_v36 = vld [vmem:[#allocation6 + $0xc8] sm:$0xff]  ;;  %v100_v38 = vld [vmem:[#allocation6 + $0xd8] sm:$0xff] }
  0x40   :  { %630 = vmatpush1.bf16.msra.mxu0 %v629_v22  ;;  %v102_v37 = vld [vmem:[#allocation6 + $0xe8] sm:$0xff]  ;;  %v665_v39 = vpack.c.bf16 %v95_v34, %v91_v33  ;;  %v104_v41 = vld [vmem:[#allocation6 + $0xf8] sm:$0xff]  ;;  %v97_v42 = vld [vmem:[#allocation6 + $0xc0] sm:$0xff] }
  0x41   :  { %662 = vmatpush1.bf16.msra.mxu1 %v661_v26  ;;  %632 = vmatprep.subr.bf16.mxu0 %v631_v27  ;;  %v635_v40 = vpack.c.bf16 %v102_v37, %v98_v36  ;;  %v101_v43 = vld [vmem:[#allocation6 + $0xe0] sm:$0xff]  ;;  %v667_v44 = vpack.c.bf16 %v104_v41, %v100_v38  ;;  %v99_v45 = vld [vmem:[#allocation6 + $0xd0] sm:$0xff]  ;;  %v106_v47 = vld [vmem:[#allocation6 + $0x108] sm:$0xff] }
  0x42   :  { %664 = vmatprep.subr.bf16.mxu1 %v663_v31  ;;  %v103_v46 = vld [vmem:[#allocation6 + $0xf0] sm:$0xff]  ;;  %v110_v48 = vld [vmem:[#allocation6 + $0x128] sm:$0xff]  ;;  %v108_v49 = vld [vmem:[#allocation6 + $0x118] sm:$0xff]  ;;  %v637_v51 = vpack.c.bf16 %v101_v43, %v97_v42 }
  0x43   :  { %v112_v50 = vld [vmem:[#allocation6 + $0x138] sm:$0xff]  ;;  %v669_v52 = vpack.c.bf16 %v103_v46, %v99_v45  ;;  %v639_v53 = vpack.c.bf16 %v110_v48, %v106_v47  ;;  %v105_v54 = vld [vmem:[#allocation6 + $0x100] sm:$0xff]  ;;  %v107_v56 = vld [vmem:[#allocation6 + $0x110] sm:$0xff] }
  0x44   :  { %634 = vmatpush1.bf16.msra.mxu0 %v633_v35  ;;  %v109_v55 = vld [vmem:[#allocation6 + $0x120] sm:$0xff]  ;;  %v671_v57 = vpack.c.bf16 %v112_v50, %v108_v49  ;;  %v111_v58 = vld [vmem:[#allocation6 + $0x130] sm:$0xff]  ;;  %v114_v59 = vld [vmem:[#allocation6 + $0x148] sm:$0xff] }
  0x45   :  { %666 = vmatpush1.bf16.msra.mxu1 %v665_v39  ;;  %636 = vmatprep.subr.bf16.mxu0 %v635_v40  ;;  %v118_v60 = vld [vmem:[#allocation6 + $0x168] sm:$0xff]  ;;  %v116_v61 = vld [vmem:[#allocation6 + $0x158] sm:$0xff]  ;;  %v641_v63 = vpack.c.bf16 %v109_v55, %v105_v54  ;;  %v673_v0 = vpack.c.bf16 %v111_v58, %v107_v56  ;;  %v113_v2 = vld [vmem:[#allocation6 + $0x140] sm:$0xff] }
  0x46   :  { %668 = vmatprep.subr.bf16.mxu1 %v667_v44  ;;  %v120_v62 = vld [vmem:[#allocation6 + $0x178] sm:$0xff]  ;;  %v643_v1 = vpack.c.bf16 %v118_v60, %v114_v59  ;;  %v117_v3 = vld [vmem:[#allocation6 + $0x160] sm:$0xff]  ;;  %v115_v4 = vld [vmem:[#allocation6 + $0x150] sm:$0xff] }
  0x47   :  { %v675_v5 = vpack.c.bf16 %v120_v62, %v116_v61  ;;  %v119_v6 = vld [vmem:[#allocation6 + $0x170] sm:$0xff]  ;;  %v122_v7 = vld [vmem:[#allocation6 + $0x188] sm:$0xff]  ;;  %v124_v9 = vld [vmem:[#allocation6 + $0x198] sm:$0xff]  ;;  %v645_v11 = vpack.c.bf16 %v117_v3, %v113_v2 }
  0x48   :  { %638 = vmatpush1.bf16.msra.mxu0 %v637_v51  ;;  %v126_v8 = vld [vmem:[#allocation6 + $0x1a8] sm:$0xff]  ;;  %v128_v10 = vld [vmem:[#allocation6 + $0x1b8] sm:$0xff]  ;;  %v677_v12 = vpack.c.bf16 %v119_v6, %v115_v4  ;;  %v121_v14 = vld [vmem:[#allocation6 + $0x180] sm:$0xff] }
  0x49   :  { %670 = vmatpush1.bf16.msra.mxu1 %v669_v52  ;;  %640 = vmatprep.subr.bf16.mxu0 %v639_v53  ;;  %v647_v13 = vpack.c.bf16 %v126_v8, %v122_v7  ;;  %v125_v15 = vld [vmem:[#allocation6 + $0x1a0] sm:$0xff]  ;;  %v123_v16 = vld [vmem:[#allocation6 + $0x190] sm:$0xff]  ;;  %v679_v17 = vpack.c.bf16 %v128_v10, %v124_v9  ;;  %v130_v19 = vld [vmem:[#allocation6 + $0x1c8] sm:$0xff] }
  0x4a   :  { %672 = vmatprep.subr.bf16.mxu1 %v671_v57  ;;  %v127_v18 = vld [vmem:[#allocation6 + $0x1b0] sm:$0xff]  ;;  %v134_v20 = vld [vmem:[#allocation6 + $0x1e8] sm:$0xff]  ;;  %v132_v21 = vld [vmem:[#allocation6 + $0x1d8] sm:$0xff]  ;;  %v649_v23 = vpack.c.bf16 %v125_v15, %v121_v14 }
  0x4b   :  { %v136_v22 = vld [vmem:[#allocation6 + $0x1f8] sm:$0xff]  ;;  %v681_v24 = vpack.c.bf16 %v127_v18, %v123_v16  ;;  %v651_v25 = vpack.c.bf16 %v134_v20, %v130_v19  ;;  %v129_v26 = vld [vmem:[#allocation6 + $0x1c0] sm:$0xff]  ;;  %v131_v28 = vld [vmem:[#allocation6 + $0x1d0] sm:$0xff] }
  0x4c   :  { %642 = vmatpush1.bf16.msra.mxu0 %v641_v63  ;;  %v133_v27 = vld [vmem:[#allocation6 + $0x1e0] sm:$0xff]  ;;  %v683_v29 = vpack.c.bf16 %v136_v22, %v132_v21  ;;  %v135_v30 = vld [vmem:[#allocation6 + $0x1f0] sm:$0xff]  ;;  %v341_v32 = vld [vmem:[#allocation8 + $0x88] sm:$0xff] }
  0x4d   :  { %674 = vmatpush1.bf16.msra.mxu1 %v673_v0  ;;  %644 = vmatprep.subr.bf16.mxu0 %v643_v1  ;;  %v340_v31 = vld [vmem:[#allocation8 + $0x80] sm:$0xff]  ;;  %v373_v34 = vld [vmem:[#allocation8 + $0x188] sm:$0xff]  ;;  %v653_v35 = vpack.c.bf16 %v133_v27, %v129_v26  ;;  %v685_v36 = vpack.c.bf16 %v135_v30, %v131_v28  ;;  %v342_v43 = vld [vmem:[#allocation8 + $0x90] sm:$0xff] }
  0x4e   :  { %676 = vmatprep.subr.bf16.mxu1 %v675_v5  ;;  %v372_v33 = vld [vmem:[#allocation8 + $0x180] sm:$0xff]  ;;  %v687_v37 = vpack.c.bf16 %v341_v32, %v340_v31  ;;  %v325_v39 = vld [vmem:[#allocation8 + $0x8] sm:$0xff]  ;;  %v343_v44 = vld [vmem:[#allocation8 + $0x98] sm:$0xff] }
  0x4f   :  { %v324_v38 = vld [vmem:[#allocation8] sm:$0xff]  ;;  %v719_v41 = vpack.c.bf16 %v373_v34, %v372_v33  ;;  %v357_v42 = vld [vmem:[#allocation8 + $0x108] sm:$0xff]  ;;  %v374_v45 = vld [vmem:[#allocation8 + $0x190] sm:$0xff]  ;;  %v691_v50 = vpack.c.bf16 %v343_v44, %v342_v43 }
  0x50   :  { %646 = vmatpush1.bf16.msra.mxu0 %v645_v11  ;;  %v356_v40 = vld [vmem:[#allocation8 + $0x100] sm:$0xff]  ;;  %v375_v46 = vld [vmem:[#allocation8 + $0x198] sm:$0xff]  ;;  %v689_v48 = vpack.c.bf16 %v325_v39, %v324_v38  ;;  %v326_v51 = vld [vmem:[#allocation8 + $0x10] sm:$0xff] }
  0x51   :  { %678 = vmatpush1.bf16.msra.mxu1 %v677_v12  ;;  %648 = vmatprep.subr.bf16.mxu0 %v647_v13  ;;  %v68_v47 = vld [vmem:[#allocation3] sm:$0xff]  ;;  %v721_v49 = vpack.c.bf16 %v357_v42, %v356_v40  ;;  %v358_v53 = vld [vmem:[#allocation8 + $0x110] sm:$0xff]  ;;  %v723_v54 = vpack.c.bf16 %v375_v46, %v374_v45  ;;  %v344_v56 = vld [vmem:[#allocation8 + $0xa0] sm:$0xff] }
  0x52   :  { %680 = vmatprep.subr.bf16.mxu1 %v679_v17  ;;  %v327_v52 = vld [vmem:[#allocation8 + $0x18] sm:$0xff]  ;;  %v345_v57 = vld [vmem:[#allocation8 + $0xa8] sm:$0xff]  ;;  %v376_v58 = vld [vmem:[#allocation8 + $0x1a0] sm:$0xff] }
  0x53   :  { %v359_v55 = vld [vmem:[#allocation8 + $0x118] sm:$0xff]  ;;  %v377_v59 = vld [vmem:[#allocation8 + $0x1a8] sm:$0xff]  ;;  %v693_v60 = vpack.c.bf16 %v327_v52, %v326_v51  ;;  %v695_v62 = vpack.c.bf16 %v345_v57, %v344_v56  ;;  %v328_v63 = vld [vmem:[#allocation8 + $0x20] sm:$0xff] }
  0x54   :  { %650 = vmatpush1.bf16.msra.mxu0 %v649_v23  ;;  %v725_v61 = vpack.c.bf16 %v359_v55, %v358_v53  ;;  %v329_v0 = vld [vmem:[#allocation8 + $0x28] sm:$0xff]  ;;  %v360_v1 = vld [vmem:[#allocation8 + $0x120] sm:$0xff]  ;;  %v727_v2 = vpack.c.bf16 %v377_v59, %v376_v58  ;;  %v346_v4 = vld [vmem:[#allocation8 + $0xb0] sm:$0xff] }
  0x55   :  { %682 = vmatpush1.bf16.msra.mxu1 %v681_v24  ;;  %652 = vmatprep.subr.bf16.mxu0 %v651_v25  ;;  %v361_v3 = vld [vmem:[#allocation8 + $0x128] sm:$0xff]  ;;  %v347_v5 = vld [vmem:[#allocation8 + $0xb8] sm:$0xff]  ;;  %v378_v6 = vld [vmem:[#allocation8 + $0x1b0] sm:$0xff]  ;;  %v697_v8 = vpack.c.bf16 %v329_v0, %v328_v63 }
  0x56   :  { %684 = vmatprep.subr.bf16.mxu1 %v683_v29  ;;  %v379_v7 = vld [vmem:[#allocation8 + $0x1b8] sm:$0xff]  ;;  %v729_v9 = vpack.c.bf16 %v361_v3, %v360_v1  ;;  %v699_v10 = vpack.c.bf16 %v347_v5, %v346_v4  ;;  %v330_v11 = vld [vmem:[#allocation8 + $0x30] sm:$0xff]  ;;  %v348_v16 = vld [vmem:[#allocation8 + $0xc0] sm:$0xff] }
  0x57   :  { %v331_v12 = vld [vmem:[#allocation8 + $0x38] sm:$0xff]  ;;  %v362_v13 = vld [vmem:[#allocation8 + $0x130] sm:$0xff]  ;;  %v731_v14 = vpack.c.bf16 %v379_v7, %v378_v6  ;;  %v349_v17 = vld [vmem:[#allocation8 + $0xc8] sm:$0xff] }
  0x58   :  { %654 = vmatpush1.bf16.msra.mxu0 %v653_v35  ;;  %v363_v15 = vld [vmem:[#allocation8 + $0x138] sm:$0xff]  ;;  %v380_v18 = vld [vmem:[#allocation8 + $0x1c0] sm:$0xff]  ;;  %v381_v19 = vld [vmem:[#allocation8 + $0x1c8] sm:$0xff]  ;;  %v701_v20 = vpack.c.bf16 %v331_v12, %v330_v11  ;;  %v703_v22 = vpack.c.bf16 %v349_v17, %v348_v16 }
  0x59   :  { %686 = vmatpush1.bf16.msra.mxu1 %v685_v36  ;;  %688 = vmatprep.subr.bf16.mxu0 %v687_v37  ;;  %v733_v21 = vpack.c.bf16 %v363_v15, %v362_v13  ;;  %v332_v23 = vld [vmem:[#allocation8 + $0x40] sm:$0xff]  ;;  %v333_v24 = vld [vmem:[#allocation8 + $0x48] sm:$0xff]  ;;  %v735_v26 = vpack.c.bf16 %v381_v19, %v380_v18  ;;  %v350_v28 = vld [vmem:[#allocation8 + $0xd0] sm:$0xff] }
  0x5a   :  { %720 = vmatprep.subr.bf16.mxu1 %v719_v41  ;;  %v364_v25 = vld [vmem:[#allocation8 + $0x140] sm:$0xff]  ;;  %v365_v27 = vld [vmem:[#allocation8 + $0x148] sm:$0xff]  ;;  %v351_v29 = vld [vmem:[#allocation8 + $0xd8] sm:$0xff]  ;;  %v705_v32 = vpack.c.bf16 %v333_v24, %v332_v23 }
  0x5b   :  { %202 = vmatmul.mubr.f32.vlgmr.msra.gmra.mrb[0].mxu0 %v68_v47  ;;  %v382_v30 = vld [vmem:[#allocation8 + $0x1d0] sm:$0xff]  ;;  %v383_v31 = vld [vmem:[#allocation8 + $0x1d8] sm:$0xff]  ;;  %v737_v33 = vpack.c.bf16 %v365_v27, %v364_v25  ;;  %v707_v34 = vpack.c.bf16 %v351_v29, %v350_v28  ;;  %v352_v40 = vld [vmem:[#allocation8 + $0xe0] sm:$0xff] }
  0x5c   :  { %273 = vmatmul.mubr.f32.vlgmr.msra.gmra.mrb[0].mxu1 %v68_v47  ;;  %690 = vmatpush3.bf16.msra.mxu0 %v689_v48  ;;  %v334_v35 = vld [vmem:[#allocation8 + $0x50] sm:$0xff]  ;;  %v335_v36 = vld [vmem:[#allocation8 + $0x58] sm:$0xff]  ;;  %v739_v38 = vpack.c.bf16 %v383_v31, %v382_v30  ;;  %v353_v41 = vld [vmem:[#allocation8 + $0xe8] sm:$0xff] }
  0x5d   :  { %722 = vmatpush3.bf16.msra.mxu1 %v721_v49  ;;  %692 = vmatprep.subr.bf16.mxu0 %v691_v50  ;;  %v366_v37 = vld [vmem:[#allocation8 + $0x150] sm:$0xff]  ;;  %v367_v39 = vld [vmem:[#allocation8 + $0x158] sm:$0xff]  ;;  %v384_v42 = vld [vmem:[#allocation8 + $0x1e0] sm:$0xff]  ;;  %v709_v44 = vpack.c.bf16 %v335_v36, %v334_v35  ;;  %v711_v46 = vpack.c.bf16 %v353_v41, %v352_v40 }
  0x5e   :  { %724 = vmatprep.subr.bf16.mxu1 %v723_v54  ;;  %v385_v43 = vld [vmem:[#allocation8 + $0x1e8] sm:$0xff]  ;;  %v741_v45 = vpack.c.bf16 %v367_v39, %v366_v37  ;;  %v336_v48 = vld [vmem:[#allocation8 + $0x60] sm:$0xff]  ;;  %v354_v54 = vld [vmem:[#allocation8 + $0xf0] sm:$0xff] }
  0x5f   :  { %v743_v47 = vpack.c.bf16 %v385_v43, %v384_v42  ;;  %v337_v49 = vld [vmem:[#allocation8 + $0x68] sm:$0xff]  ;;  %v368_v50 = vld [vmem:[#allocation8 + $0x160] sm:$0xff]  ;;  %v355_v55 = vld [vmem:[#allocation8 + $0xf8] sm:$0xff] }
  0x60   :  { %694 = vmatpush3.bf16.msra.mxu0 %v693_v60  ;;  %v713_v51 = vpack.c.bf16 %v337_v49, %v336_v48  ;;  %v369_v52 = vld [vmem:[#allocation8 + $0x168] sm:$0xff]  ;;  %v386_v56 = vld [vmem:[#allocation8 + $0x1f0] sm:$0xff]  ;;  %v715_v57 = vpack.c.bf16 %v355_v55, %v354_v54  ;;  %v387_v58 = vld [vmem:[#allocation8 + $0x1f8] sm:$0xff] }
  0x61   :  { %726 = vmatpush3.bf16.msra.mxu1 %v725_v61  ;;  %696 = vmatprep.subr.bf16.mxu0 %v695_v62  ;;  %v745_v53 = vpack.c.bf16 %v369_v52, %v368_v50  ;;  %v338_v59 = vld [vmem:[#allocation8 + $0x70] sm:$0xff]  ;;  %v339_v60 = vld [vmem:[#allocation8 + $0x78] sm:$0xff]  ;;  %v747_v61 = vpack.c.bf16 %v387_v58, %v386_v56 }
  0x62   :  { %728 = vmatprep.subr.bf16.mxu1 %v727_v2  ;;  %v717_v62 = vpack.c.bf16 %v339_v60, %v338_v59  ;;  %v370_v63 = vld [vmem:[#allocation8 + $0x170] sm:$0xff]  ;;  %v371_v0 = vld [vmem:[#allocation8 + $0x178] sm:$0xff]  ;;  %v296_v2 = vlaneseq }
  0x63   :  { %v749_v1 = vpack.c.bf16 %v371_v0, %v370_v63  ;;  %v294_v5 = vld [vmem:[%s949_s2] sm:$0xf] }
  0x64   :  { %698 = vmatpush3.bf16.msra.mxu0 %v697_v8  ;;  %v297_v3 = vshrl.u32 %v296_v2, 7  ;;  %v552_v27 = vld [vmem:[%s951_s4] ss:$0 sm:$0xff] }
  0x65   :  { %730 = vmatpush3.bf16.msra.mxu1 %v729_v9  ;;  %700 = vmatprep.subr.bf16.mxu0 %v699_v10 }
  0x66   :  { %732 = vmatprep.subr.bf16.mxu1 %v731_v14  ;;  %v298_v4 = vsub.s32 0, %v297_v3  ;;  %v306_v6 = vsub.s32 2, %v297_v3  ;;  %v302_v7 = vsub.s32 1, %v297_v3  ;;  %v310_v8 = vsub.s32 3, %v297_v3 }
  0x68   :  { %702 = vmatpush3.bf16.msra.mxu0 %v701_v20  ;;  %v299_v9 = vrot.slane %v294_v5, %v298_v4  ;;  %v307_v10 = vrot.slane %v294_v5, %v306_v6  ;;  %v303_v11 = vrot.slane %v294_v5, %v302_v7  ;;  %v311_v12 = vrot.slane %v294_v5, %v310_v8 }
  0x69   :  { %734 = vmatpush3.bf16.msra.mxu1 %v733_v21  ;;  %704 = vmatprep.subr.bf16.mxu0 %v703_v22 }
  0x6a   :  { %736 = vmatprep.subr.bf16.mxu1 %v735_v26 }
  0x6c   :  { %706 = vmatpush3.bf16.msra.mxu0 %v705_v32 }
  0x6d   :  { %738 = vmatpush3.bf16.msra.mxu1 %v737_v33  ;;  %708 = vmatprep.subr.bf16.mxu0 %v707_v34 }
  0x6e   :  { %740 = vmatprep.subr.bf16.mxu1 %v739_v38 }
  0x70   :  { %710 = vmatpush3.bf16.msra.mxu0 %v709_v44 }
  0x71   :  { %742 = vmatpush3.bf16.msra.mxu1 %v741_v45  ;;  %712 = vmatprep.subr.bf16.mxu0 %v711_v46 }
  0x72   :  { %744 = vmatprep.subr.bf16.mxu1 %v743_v47 }
  0x74   :  { %714 = vmatpush3.bf16.msra.mxu0 %v713_v51 }
  0x75   :  { %746 = vmatpush3.bf16.msra.mxu1 %v745_v53  ;;  %716 = vmatprep.subr.bf16.mxu0 %v715_v57 }
  0x76   :  { %748 = vmatprep.subr.bf16.mxu1 %v747_v61 }
  0x78   :  { %718 = vmatpush3.bf16.msra.mxu0 %v717_v62 }
  0x79   :  { %750 = vmatpush3.bf16.msra.mxu1 %v749_v1 }
 0x12e   :  { %v203_v13 = vpop.f32.mrb[0].mxu0 }
 0x12f   :  { %v316_v14 = vadd.f32 %v299_v9, %v203_v13  ;;  %v274_v15 = vpop.f32.mrb[0].mxu1  ;;  %v205_v16 = vpop.f32.mrb[1].mxu0 }
 0x130   :  { %v318_v17 = vadd.f32 %v307_v10, %v274_v15  ;;  %v317_v18 = vadd.f32 %v303_v11, %v205_v16  ;;  %v276_v19 = vpop.f32.mrb[1].mxu1 }
 0x131   :  { %v319_v20 = vadd.f32 %v311_v12, %v276_v19  ;;  %v320_v23 = vmax.f32 %v316_v14, 0.0 }
 0x132   :  { %v322_v21 = vmax.f32 %v318_v17, 0.0  ;;  %v321_v22 = vmax.f32 %v317_v18, 0.0 }
 0x133   :  { %v323_v24 = vmax.f32 %v319_v20, 0.0 }
 0x134   :  { %459 = vmatprep.mubr.f32.mxu0 %v321_v22 }
 0x135   :  { %529 = vmatprep.mubr.f32.mxu1 %v323_v24  ;;  %460 = vmatmul.mubr.f32.vlgmr.msra.gmra.mrb[2].mxu0 %v320_v23 }
 0x136   :  { %530 = vmatmul.mubr.f32.vlgmr.msra.gmra.mrb[2].mxu1 %v322_v21 }
 0x208   :  { %v585_v25 = vpop.f32.mrb[2].mxu0 }
 0x209   :  { %v620_v26 = vpop.f32.mrb[2].mxu1  ;;  %v586_v28 = vpop.f32.mrb[3].mxu0 }
 0x20a   :  { %v587_v29 = vadd.f32 %v586_v28, %v585_v25  ;;  %v621_v30 = vpop.f32.mrb[3].mxu1 }
 0x20b   :  { %v622_v31 = vadd.f32 %v621_v30, %v620_v26 }
 0x20c   :  { %v462_v32 = vadd.f32 %v587_v29, %v552_v27 }
 0x20e   :  { %v532_v33 = vadd.f32 %v622_v31, %v462_v32 }
 0x210   :  { %535 = vst [vmem:[#allocation9] sm:$0xff] %v532_v33 }
 0x211   :  { %837 = shalt.err (!%p834_p0)
}
 0x212   :  { %s838_s4 = scalar_lea.hbm %s952_s5, 128 }
 0x213   :  { %p839_p1 = scmp.ne.s32.totalorder %s952_s5, %s838_s4  ;;  %p842_p2 = scmp.lt.u32.totalorder %s838_s4, %s952_s5 }
 0x215   :  { %p844_p3 = pnand %p842_p2, %p839_p1 }
 0x217   :  { %847 = shalt.err (!%p844_p3)
}
 0x218   :  { %545 = dma.vmem_to_hbm [thread:$0]  %s543_s9, 128, %s952_s5, [#allocation5]  }
 0x219   :  { %852 = dma.done.wait [#allocation5], 128  }
 0x21a   :  { %853 = vsyncadd [#allocation5], 4294967168 }
 0x21b   :  { %549 = vsyncpa [#allocation4], 1 }
 0x21c   :  { %550 = vsyncpa [#allocation7], 1 }
 0x21d   :  { %551 = vsyncpa [#allocation5], 1 }

</bundles_post_ra>
